<compile_context>
chip_gen: v7x
topology: tpu7x:2x2x1
jax: 0.10.0
libtpu: 0.0.40
codegen_flags: <defaults>
</compile_context>

<pallas_src>
import jax
import jax.numpy as jnp
import numpy as np
from jax.experimental import pallas as pl
from jax.experimental.pallas import tpu as pltpu


# --------------------------------------------------------------------------- #
# Planning helpers
# --------------------------------------------------------------------------- #
def _roundup(x, m):
    return ((x + m - 1) // m) * m


def _vmem_ceiling_bytes():
    """VMEM budget with headroom (v7x has only 64 MiB physical per TensorCore)."""
    try:
        cap = int(pltpu.get_tpu_info().vmem_capacity_bytes)
        return max(16 << 20, (cap * 3) // 4)
    except Exception:
        return 48 << 20


def _estimate_vmem_bytes(*, G, tq, Dh, N, in_itemsize, attn_itemsize, return_attn):
    """Rough per-step VMEM footprint (lane/sublane padded, x2 double-buffered)."""
    lane = 128
    q_b = G * _roundup(tq, 8) * _roundup(Dh, lane) * in_itemsize
    kt_b = G * _roundup(Dh, 8) * _roundup(N, lane) * in_itemsize
    v_b = G * _roundup(N, 8) * _roundup(Dh, lane) * in_itemsize
    ctx_b = _roundup(tq, 8) * _roundup(G * Dh, lane) * 4
    attn_b = (G * _roundup(tq, 8) * _roundup(N, lane) * attn_itemsize) if return_attn else 0
    work = 2 * G * _roundup(tq, 8) * _roundup(N, lane) * 4         # f32 scores / probs
    return 2 * (q_b + kt_b + v_b + ctx_b + attn_b) + work + (4 << 20)


def _head_group_candidates(H, Dh, *, lane_target=256):
    """Head-group sizes G (divisors of H) whose context tile G*Dh is lane
    aligned (multiple of 128) or equal to C; preferred choice first."""
    divs = [g for g in range(1, H + 1) if H % g == 0]
    valid = [g for g in divs if (g * Dh) % 128 == 0 or g == H]
    preferred = next((g for g in valid if g * Dh >= lane_target), valid[-1])
    fallbacks = [g for g in reversed(valid) if g < preferred]   # smaller groups = less VMEM
    return [preferred] + fallbacks


def _shrink_tile(tq, sub):
    t = max(sub, tq // 2)
    return max(sub, (t // sub) * sub)


def _plan_tiles(*, B, N, H, Dh, sub, in_itemsize, attn_itemsize, return_attn):
    """Pick (G, tq, padded Nq, vmem_limit) under the VMEM budget while keeping
    >= 2 grid steps on the parallel axes (v7x has two TensorCores)."""
    ceiling = _vmem_ceiling_bytes()
    chosen = None
    for G in _head_group_candidates(H, Dh):
        HG = H // G

        def est(t, G=G):
            return _estimate_vmem_bytes(G=G, tq=t, Dh=Dh, N=N,
                                        in_itemsize=in_itemsize,
                                        attn_itemsize=attn_itemsize,
                                        return_attn=return_attn)

        tq = max(sub, min(256, _roundup(min(N, 256), sub)))
        while tq > sub and est(tq) > ceiling:
            tq = _shrink_tile(tq, sub)
        nq = _roundup(N, tq)
        while B * HG * (nq // tq) < 2 and tq > sub:
            tq = _shrink_tile(tq, sub)
            nq = _roundup(N, tq)
        vmem = int(min(max(est(tq), 16 << 20), ceiling))
        chosen = (G, tq, nq, vmem)
        if est(tq) <= ceiling:
            break
    return chosen


# --------------------------------------------------------------------------- #
# Kernel
# --------------------------------------------------------------------------- #
def _make_attention_core_kernel(*, scale, compute_dtype, precise, return_attn,
                                group_heads, head_dim):
    """Attention core for one (batch, head-group, q-tile) grid step.

    Refs per step:
      q_ref   : (1, G, tq, Dh)   query tile
      kt_ref  : (1, G, Dh, N)    K pre-transposed, whole key axis resident
      v_ref   : (1, G, N,  Dh)   V, whole key axis resident
      ctx_ref : (1, tq, G*Dh)    lane-dense context block (heads-major channels)
      attn_ref: (1, G, tq, N)    optional lane-dense attention probabilities
    """
    G, Dh = group_heads, head_dim

    def body(q_ref, kt_ref, v_ref, ctx_ref, attn_ref):
        q = q_ref[0]                    # (G, tq, Dh)
        kt = kt_ref[0]                  # (G, Dh, N)  -- already transposed
        v = v_ref[0]                    # (G, N, Dh)

        # Batched (tq, Dh) x (Dh, N) matmuls on the MXU, f32 accumulation.
        s = jnp.einsum("gqd,gdn->gqn", q, kt,
                       preferred_element_type=jnp.float32) * scale

        # Numerically stable softmax over the fully-resident key axis.
        s = s - jnp.max(s, axis=-1, keepdims=True)
        p = jnp.exp(s)
        denom = jnp.sum(p, axis=-1, keepdims=True)
        if precise:
            p = p / denom
        else:
            p = p * pl.reciprocal(denom, approx=True)   # EUP slot, nearly free

        p_cd = p.astype(compute_dtype)  # cast once; reused for store + matmul
        if attn_ref is not None:
            attn_ref[0] = p_cd          # single lane-dense (G, tq, N) store

        # Per-head context written straight into the lane-dense (tq, G*Dh)
        # block (channel layout = head-major, matching PyTorch's reshape).
        for g in range(G):
            o_g = jnp.dot(p_cd[g], v[g], preferred_element_type=jnp.float32)  # (tq, Dh)
            ctx_ref[0, :, g * Dh:(g + 1) * Dh] = o_g.astype(ctx_ref.dtype)

    if return_attn:
        def kernel(q_ref, kt_ref, v_ref, ctx_ref, attn_ref):
            body(q_ref, kt_ref, v_ref, ctx_ref, attn_ref)
        return kernel

    def kernel_no_attn(q_ref, kt_ref, v_ref, ctx_ref):
        body(q_ref, kt_ref, v_ref, ctx_ref, None)
    return kernel_no_attn


# --------------------------------------------------------------------------- #
# Wrapper
# --------------------------------------------------------------------------- #
def attention_forward(x, w_qkv, b_qkv, w_proj, b_proj, *, num_heads,
                      return_attn=True, precise=False):
    """x: (B, N, C).  w_qkv: (3C, C), b_qkv: (3C,), w_proj: (C, C), b_proj: (C,).

    precise=False (default perf path): bf16 MXU operands / f32 accumulation,
        approx reciprocal, bf16 attention-probability writeback.
    precise=True : f32 everywhere, exact softmax division (PyTorch parity).
    return_attn=False drops the (B, H, N, N) attention output entirely.
    """
    B, N, C = x.shape
    H = num_heads
    assert C % H == 0, "dim must be divisible by num_heads"
    Dh = C // H
    scale = float(Dh) ** -0.5
    compute_dtype = jnp.float32 if precise else jnp.bfloat16
    itemsize = jnp.dtype(compute_dtype).itemsize

    # ---- QKV projection once, as a plain lane-dense XLA GEMM ---------------
    qkv = jnp.einsum("bnc,dc->bnd", x, w_qkv) + b_qkv             # (B, N, 3C)
    qkv = qkv.reshape(B, N, 3, H, Dh)
    q = jnp.transpose(qkv[:, :, 0], (0, 2, 1, 3))                 # (B, H, N, Dh)
    k = jnp.transpose(qkv[:, :, 1], (0, 2, 1, 3))
    v = jnp.transpose(qkv[:, :, 2], (0, 2, 1, 3))
    kt = jnp.swapaxes(k, -1, -2)                                  # (B, H, Dh, N)

    G, tq, nq, vmem_limit = _plan_tiles(
        B=B, N=N, H=H, Dh=Dh, sub=(8 if precise else 16),
        in_itemsize=itemsize, attn_itemsize=itemsize, return_attn=return_attn)
    HG = H // G

    if nq != N:                       # pad the QUERY axis only (keys stay exact)
        q = jnp.pad(q, ((0, 0), (0, 0), (0, nq - N), (0, 0)))

    q = q.astype(compute_dtype)
    kt = kt.astype(compute_dtype)
    v = v.astype(compute_dtype)

    kernel = _make_attention_core_kernel(
        scale=scale, compute_dtype=compute_dtype, precise=precise,
        return_attn=return_attn, group_heads=G, head_dim=Dh)

    # q-tile axis innermost: K^T / V block indices depend only on (b, hg), so
    # the pipeline keeps them resident across all q tiles (no re-DMA).
    grid = (B, HG, nq // tq)
    in_specs = [
        pl.BlockSpec((1, G, tq, Dh), lambda b, hg, i: (b, hg, i, 0)),   # q tile
        pl.BlockSpec((1, G, Dh, N), lambda b, hg, i: (b, hg, 0, 0)),    # K^T (full seq)
        pl.BlockSpec((1, G, N, Dh), lambda b, hg, i: (b, hg, 0, 0)),    # V   (full seq)
    ]
    ctx_spec = pl.BlockSpec((1, tq, G * Dh), lambda b, hg, i: (b, i, hg))
    if return_attn:
        out_shape = (jax.ShapeDtypeStruct((B, nq, C), jnp.float32),
                     jax.ShapeDtypeStruct((B, H, nq, N), compute_dtype))
        out_specs = (ctx_spec,
                     pl.BlockSpec((1, G, tq, N), lambda b, hg, i: (b, hg, i, 0)))
    else:
        out_shape = jax.ShapeDtypeStruct((B, nq, C), jnp.float32)
        out_specs = ctx_spec

    res = pl.pallas_call(
        kernel,
        out_shape=out_shape,
        grid_spec=pltpu.PrefetchScalarGridSpec(
            num_scalar_prefetch=0, grid=grid,
            in_specs=in_specs, out_specs=out_specs),
        compiler_params=pltpu.CompilerParams(
            dimension_semantics=("parallel", "parallel", "parallel"),
            vmem_limit_bytes=vmem_limit),
    )(q, kt, v)

    if return_attn:
        ctx, attn = res
        attn = attn[:, :, :N, :]
    else:
        ctx, attn = res, None
    ctx = ctx[:, :N]

    # Output projection as a plain XLA GEMM on the lane-dense context slab.
    out = jnp.einsum("bnc,dc->bnd", ctx, w_proj) + b_proj
    return out, attn


# --------------------------------------------------------------------------- #
# Pure-JAX reference mirroring the PyTorch forward (with_qkv=True, p=0.0)
# --------------------------------------------------------------------------- #
def attention_reference(x, w_qkv, b_qkv, w_proj, b_proj, *, num_heads):
    B, N, C = x.shape
    head_dim = C // num_heads
    scale = head_dim ** (-0.5)
    qkv = jnp.einsum("bnc,dc->bnd", x, w_qkv) + b_qkv             # (B, N, 3C)
    qkv = qkv.reshape(B, N, 3, num_heads, head_dim).transpose(2, 0, 3, 1, 4)
    q, k, v = qkv[0], qkv[1], qkv[2]                              # (B, H, N, Dh)
    attn = jnp.einsum("bhqd,bhkd->bhqk", q, k) * scale
    attn = jax.nn.softmax(attn, axis=-1)
    o = jnp.einsum("bhqk,bhkd->bhqd", attn, v)                    # (B, H, N, Dh)
    o = o.transpose(0, 2, 1, 3).reshape(B, N, C)
    o = jnp.einsum("bnc,dc->bnd", o, w_proj) + b_proj
    return o, attn


if __name__ == "__main__":
    # Small shapes consistent with the module: dim divisible by num_heads=12.
    B, N, C = 2, 8, 96
    num_heads = 12

    key = jax.random.PRNGKey(0)
    kx, k1, k2, k3, k4 = jax.random.split(key, 5)

    x = jax.random.normal(kx, (B, N, C), dtype=jnp.float32)
    w_qkv = jax.random.normal(k1, (3 * C, C), dtype=jnp.float32) * 0.05
    b_qkv = jax.random.normal(k2, (3 * C,), dtype=jnp.float32) * 0.05
    w_proj = jax.random.normal(k3, (C, C), dtype=jnp.float32) * 0.05
    b_proj = jax.random.normal(k4, (C,), dtype=jnp.float32) * 0.05

    ref_out, ref_attn = attention_reference(x, w_qkv, b_qkv, w_proj, b_proj,
                                            num_heads=num_heads)

    # 1) Parity path: f32 operands + exact softmax division, returning attn.
    out, attn = attention_forward(x, w_qkv, b_qkv, w_proj, b_proj,
                                  num_heads=num_heads, return_attn=True,
                                  precise=True)
    jax.block_until_ready((out, attn))
    np.testing.assert_allclose(np.asarray(out), np.asarray(ref_out),
                               rtol=2e-5, atol=2e-5)
    np.testing.assert_allclose(np.asarray(attn), np.asarray(ref_attn),
                               rtol=2e-5, atol=2e-5)

    # 2) Default fast path: bf16 MXU operands, approx reciprocal, bf16 attn.
    out_f, attn_f = attention_forward(x, w_qkv, b_qkv, w_proj, b_proj,
                                      num_heads=num_heads, return_attn=True)
    jax.block_until_ready((out_f, attn_f))
    np.testing.assert_allclose(np.asarray(out_f), np.asarray(ref_out),
                               rtol=2e-2, atol=2e-2)
    np.testing.assert_allclose(np.asarray(attn_f.astype(jnp.float32)),
                               np.asarray(ref_attn), rtol=2e-2, atol=2e-2)

    # 3) attn-free path: drops the (B, H, N, N) HBM writeback entirely.
    out_na, attn_na = attention_forward(x, w_qkv, b_qkv, w_proj, b_proj,
                                        num_heads=num_heads, return_attn=False,
                                        precise=True)
    jax.block_until_ready(out_na)
    assert attn_na is None
    np.testing.assert_allclose(np.asarray(out_na), np.asarray(ref_out),
                               rtol=2e-5, atol=2e-5)

    print("KERNEL_OK")
</pallas_src>

<mosaic_0001>
module attributes {stable_mosaic.version = 11 : i64} {
  func.func @kernel(%arg0: i32, %arg1: i32, %arg2: i32, %arg3: memref<1x12x8x8xf32, #tpu.memory_space<vmem>>, %arg4: memref<1x12x8x8xf32, #tpu.memory_space<vmem>>, %arg5: memref<1x12x8x8xf32, #tpu.memory_space<vmem>>, %arg6: memref<1x8x96xf32, #tpu.memory_space<vmem>>, %arg7: memref<1x12x8x8xf32, #tpu.memory_space<vmem>>) attributes {dimension_semantics = [#tpu.dimension_semantics<parallel>, #tpu.dimension_semantics<parallel>, #tpu.dimension_semantics<parallel>], iteration_bounds = array<i64: 2, 1, 1>, scalar_prefetch = 0 : i64, scratch_operands = 0 : i64, tpu.core_type = #tpu.core_type<tc>, window_params = [{transform_indices = @transform_0, window_bounds = array<i64: 1, 12, 8, 8>}, {transform_indices = @transform_1, window_bounds = array<i64: 1, 12, 8, 8>}, {transform_indices = @transform_2, window_bounds = array<i64: 1, 12, 8, 8>}, {transform_indices = @transform_3, window_bounds = array<i64: 1, 8, 96>}, {transform_indices = @transform_4, window_bounds = array<i64: 1, 12, 8, 8>}]} {
    %c0 = arith.constant 0 : index
    %c0_0 = arith.constant 0 : index
    %c0_1 = arith.constant 0 : index
    %c0_2 = arith.constant 0 : index
    %0 = vector.load %arg3[%c0, %c0_0, %c0_1, %c0_2] : memref<1x12x8x8xf32, #tpu.memory_space<vmem>>, vector<1x12x8x8xf32>
    %1 = vector.shape_cast %0 : vector<1x12x8x8xf32> to vector<12x8x8xf32>
    %c0_3 = arith.constant 0 : index
    %c0_4 = arith.constant 0 : index
    %c0_5 = arith.constant 0 : index
    %c0_6 = arith.constant 0 : index
    %2 = vector.load %arg4[%c0_3, %c0_4, %c0_5, %c0_6] : memref<1x12x8x8xf32, #tpu.memory_space<vmem>>, vector<1x12x8x8xf32>
    %3 = vector.shape_cast %2 : vector<1x12x8x8xf32> to vector<12x8x8xf32>
    %c0_7 = arith.constant 0 : index
    %c0_8 = arith.constant 0 : index
    %c0_9 = arith.constant 0 : index
    %c0_10 = arith.constant 0 : index
    %4 = vector.load %arg5[%c0_7, %c0_8, %c0_9, %c0_10] : memref<1x12x8x8xf32, #tpu.memory_space<vmem>>, vector<1x12x8x8xf32>
    %5 = vector.shape_cast %4 : vector<1x12x8x8xf32> to vector<12x8x8xf32>
    "tpu.trace_start"() <{level = 10 : i32, message = "gqd,gdn->gqn"}> : () -> ()
    %cst = arith.constant dense<0.000000e+00> : vector<12x8x8xf32>
    %6 = tpu.matmul %1, %3, %cst {dimension_numbers = #tpu.dot_dimension_numbers<[2], [1], [1], [2], [0, 0, 0, 1, 1, 2], [0], [0]>} : vector<12x8x8xf32>, vector<12x8x8xf32>, vector<12x8x8xf32> -> vector<12x8x8xf32>
    "tpu.trace_stop"() : () -> ()
    %cst_11 = arith.constant 0.353553385 : f32
    %7 = vector.broadcast %cst_11 : f32 to vector<12x8x8xf32>
    %8 = arith.mulf %6, %7 : vector<12x8x8xf32>
    %cst_12 = arith.constant dense<0xFF800000> : vector<12x8xf32>
    %9 = vector.multi_reduction <maximumf>, %8, %cst_12 [2] : vector<12x8x8xf32> to vector<12x8xf32>
    %10 = vector.shape_cast %9 : vector<12x8xf32> to vector<12x8x1xf32>
    %11 = vector.broadcast %10 : vector<12x8x1xf32> to vector<12x8x8xf32>
    %12 = arith.subf %8, %11 : vector<12x8x8xf32>
    %13 = math.exp %12 : vector<12x8x8xf32>
    %cst_13 = arith.constant dense<0.000000e+00> : vector<12x8xf32>
    %14 = vector.multi_reduction <add>, %13, %cst_13 [2] : vector<12x8x8xf32> to vector<12x8xf32>
    %15 = vector.shape_cast %14 : vector<12x8xf32> to vector<12x8x1xf32>
    %16 = vector.broadcast %15 : vector<12x8x1xf32> to vector<12x8x8xf32>
    %17 = arith.divf %13, %16 : vector<12x8x8xf32>
    %c0_14 = arith.constant 0 : index
    %c0_15 = arith.constant 0 : index
    %c0_16 = arith.constant 0 : index
    %c0_17 = arith.constant 0 : index
    %18 = vector.load %arg7[%c0_14, %c0_15, %c0_16, %c0_17] : memref<1x12x8x8xf32, #tpu.memory_space<vmem>>, vector<1x12x8x8xf32>
    %19 = vector.shape_cast %18 : vector<1x12x8x8xf32> to vector<12x8x8xf32>
    %20 = vector.shape_cast %17 : vector<12x8x8xf32> to vector<1x12x8x8xf32>
    tpu.vector_store %arg7[%c0_14, %c0_15, %c0_16, %c0_17], %20 {strides = array<i32>} : memref<1x12x8x8xf32, #tpu.memory_space<vmem>>, vector<1x12x8x8xf32>,
    %21 = vector.extract_strided_slice %17 {offsets = [0, 0, 0], sizes = [1, 8, 8], strides = [1, 1, 1]} : vector<12x8x8xf32> to vector<1x8x8xf32>
    %22 = vector.shape_cast %21 : vector<1x8x8xf32> to vector<8x8xf32>
    %23 = vector.extract_strided_slice %5 {offsets = [0, 0, 0], sizes = [1, 8, 8], strides = [1, 1, 1]} : vector<12x8x8xf32> to vector<1x8x8xf32>
    %24 = vector.shape_cast %23 : vector<1x8x8xf32> to vector<8x8xf32>
    %cst_18 = arith.constant dense<0.000000e+00> : vector<8x8xf32>
    %25 = tpu.matmul %22, %24, %cst_18 {dimension_numbers = #tpu.dot_dimension_numbers<[1], [0], [0], [1], [0, 0, 1, 1], [], []>} : vector<8x8xf32>, vector<8x8xf32>, vector<8x8xf32> -> vector<8x8xf32>
    %c0_19 = arith.constant 0 : index
    %c0_20 = arith.constant 0 : index
    %c0_21 = arith.constant 0 : index
    %26 = vector.load %arg6[%c0_19, %c0_20, %c0_21] : memref<1x8x96xf32, #tpu.memory_space<vmem>>, vector<1x8x8xf32>
    %27 = vector.shape_cast %26 : vector<1x8x8xf32> to vector<8x8xf32>
    %28 = vector.shape_cast %25 : vector<8x8xf32> to vector<1x8x8xf32>
    tpu.vector_store %arg6[%c0_19, %c0_20, %c0_21], %28 {strides = array<i32>} : memref<1x8x96xf32, #tpu.memory_space<vmem>>, vector<1x8x8xf32>,
    %29 = vector.extract_strided_slice %17 {offsets = [1, 0, 0], sizes = [1, 8, 8], strides = [1, 1, 1]} : vector<12x8x8xf32> to vector<1x8x8xf32>
    %30 = vector.shape_cast %29 : vector<1x8x8xf32> to vector<8x8xf32>
    %31 = vector.extract_strided_slice %5 {offsets = [1, 0, 0], sizes = [1, 8, 8], strides = [1, 1, 1]} : vector<12x8x8xf32> to vector<1x8x8xf32>
    %32 = vector.shape_cast %31 : vector<1x8x8xf32> to vector<8x8xf32>
    %cst_22 = arith.constant dense<0.000000e+00> : vector<8x8xf32>
    %33 = tpu.matmul %30, %32, %cst_22 {dimension_numbers = #tpu.dot_dimension_numbers<[1], [0], [0], [1], [0, 0, 1, 1], [], []>} : vector<8x8xf32>, vector<8x8xf32>, vector<8x8xf32> -> vector<8x8xf32>
    %c0_23 = arith.constant 0 : index
    %c0_24 = arith.constant 0 : index
    %c8 = arith.constant 8 : index
    %34 = vector.load %arg6[%c0_23, %c0_24, %c8] : memref<1x8x96xf32, #tpu.memory_space<vmem>>, vector<1x8x8xf32>
    %35 = vector.shape_cast %34 : vector<1x8x8xf32> to vector<8x8xf32>
    %36 = vector.shape_cast %33 : vector<8x8xf32> to vector<1x8x8xf32>
    tpu.vector_store %arg6[%c0_23, %c0_24, %c8], %36 {strides = array<i32>} : memref<1x8x96xf32, #tpu.memory_space<vmem>>, vector<1x8x8xf32>,
    %37 = vector.extract_strided_slice %17 {offsets = [2, 0, 0], sizes = [1, 8, 8], strides = [1, 1, 1]} : vector<12x8x8xf32> to vector<1x8x8xf32>
    %38 = vector.shape_cast %37 : vector<1x8x8xf32> to vector<8x8xf32>
    %39 = vector.extract_strided_slice %5 {offsets = [2, 0, 0], sizes = [1, 8, 8], strides = [1, 1, 1]} : vector<12x8x8xf32> to vector<1x8x8xf32>
    %40 = vector.shape_cast %39 : vector<1x8x8xf32> to vector<8x8xf32>
    %cst_25 = arith.constant dense<0.000000e+00> : vector<8x8xf32>
    %41 = tpu.matmul %38, %40, %cst_25 {dimension_numbers = #tpu.dot_dimension_numbers<[1], [0], [0], [1], [0, 0, 1, 1], [], []>} : vector<8x8xf32>, vector<8x8xf32>, vector<8x8xf32> -> vector<8x8xf32>
    %c0_26 = arith.constant 0 : index
    %c0_27 = arith.constant 0 : index
    %c16 = arith.constant 16 : index
    %42 = vector.load %arg6[%c0_26, %c0_27, %c16] : memref<1x8x96xf32, #tpu.memory_space<vmem>>, vector<1x8x8xf32>
    %43 = vector.shape_cast %42 : vector<1x8x8xf32> to vector<8x8xf32>
    %44 = vector.shape_cast %41 : vector<8x8xf32> to vector<1x8x8xf32>
    tpu.vector_store %arg6[%c0_26, %c0_27, %c16], %44 {strides = array<i32>} : memref<1x8x96xf32, #tpu.memory_space<vmem>>, vector<1x8x8xf32>,
    %45 = vector.extract_strided_slice %17 {offsets = [3, 0, 0], sizes = [1, 8, 8], strides = [1, 1, 1]} : vector<12x8x8xf32> to vector<1x8x8xf32>
    %46 = vector.shape_cast %45 : vector<1x8x8xf32> to vector<8x8xf32>
    %47 = vector.extract_strided_slice %5 {offsets = [3, 0, 0], sizes = [1, 8, 8], strides = [1, 1, 1]} : vector<12x8x8xf32> to vector<1x8x8xf32>
    %48 = vector.shape_cast %47 : vector<1x8x8xf32> to vector<8x8xf32>
    %cst_28 = arith.constant dense<0.000000e+00> : vector<8x8xf32>
    %49 = tpu.matmul %46, %48, %cst_28 {dimension_numbers = #tpu.dot_dimension_numbers<[1], [0], [0], [1], [0, 0, 1, 1], [], []>} : vector<8x8xf32>, vector<8x8xf32>, vector<8x8xf32> -> vector<8x8xf32>
    %c0_29 = arith.constant 0 : index
    %c0_30 = arith.constant 0 : index
    %c24 = arith.constant 24 : index
    %50 = vector.load %arg6[%c0_29, %c0_30, %c24] : memref<1x8x96xf32, #tpu.memory_space<vmem>>, vector<1x8x8xf32>
    %51 = vector.shape_cast %50 : vector<1x8x8xf32> to vector<8x8xf32>
    %52 = vector.shape_cast %49 : vector<8x8xf32> to vector<1x8x8xf32>
    tpu.vector_store %arg6[%c0_29, %c0_30, %c24], %52 {strides = array<i32>} : memref<1x8x96xf32, #tpu.memory_space<vmem>>, vector<1x8x8xf32>,
    %53 = vector.extract_strided_slice %17 {offsets = [4, 0, 0], sizes = [1, 8, 8], strides = [1, 1, 1]} : vector<12x8x8xf32> to vector<1x8x8xf32>
    %54 = vector.shape_cast %53 : vector<1x8x8xf32> to vector<8x8xf32>
    %55 = vector.extract_strided_slice %5 {offsets = [4, 0, 0], sizes = [1, 8, 8], strides = [1, 1, 1]} : vector<12x8x8xf32> to vector<1x8x8xf32>
    %56 = vector.shape_cast %55 : vector<1x8x8xf32> to vector<8x8xf32>
    %cst_31 = arith.constant dense<0.000000e+00> : vector<8x8xf32>
    %57 = tpu.matmul %54, %56, %cst_31 {dimension_numbers = #tpu.dot_dimension_numbers<[1], [0], [0], [1], [0, 0, 1, 1], [], []>} : vector<8x8xf32>, vector<8x8xf32>, vector<8x8xf32> -> vector<8x8xf32>
    %c0_32 = arith.constant 0 : index
    %c0_33 = arith.constant 0 : index
    %c32 = arith.constant 32 : index
    %58 = vector.load %arg6[%c0_32, %c0_33, %c32] : memref<1x8x96xf32, #tpu.memory_space<vmem>>, vector<1x8x8xf32>
    %59 = vector.shape_cast %58 : vector<1x8x8xf32> to vector<8x8xf32>
    %60 = vector.shape_cast %57 : vector<8x8xf32> to vector<1x8x8xf32>
    tpu.vector_store %arg6[%c0_32, %c0_33, %c32], %60 {strides = array<i32>} : memref<1x8x96xf32, #tpu.memory_space<vmem>>, vector<1x8x8xf32>,
    %61 = vector.extract_strided_slice %17 {offsets = [5, 0, 0], sizes = [1, 8, 8], strides = [1, 1, 1]} : vector<12x8x8xf32> to vector<1x8x8xf32>
    %62 = vector.shape_cast %61 : vector<1x8x8xf32> to vector<8x8xf32>
    %63 = vector.extract_strided_slice %5 {offsets = [5, 0, 0], sizes = [1, 8, 8], strides = [1, 1, 1]} : vector<12x8x8xf32> to vector<1x8x8xf32>
    %64 = vector.shape_cast %63 : vector<1x8x8xf32> to vector<8x8xf32>
    %cst_34 = arith.constant dense<0.000000e+00> : vector<8x8xf32>
    %65 = tpu.matmul %62, %64, %cst_34 {dimension_numbers = #tpu.dot_dimension_numbers<[1], [0], [0], [1], [0, 0, 1, 1], [], []>} : vector<8x8xf32>, vector<8x8xf32>, vector<8x8xf32> -> vector<8x8xf32>
    %c0_35 = arith.constant 0 : index
    %c0_36 = arith.constant 0 : index
    %c40 = arith.constant 40 : index
    %66 = vector.load %arg6[%c0_35, %c0_36, %c40] : memref<1x8x96xf32, #tpu.memory_space<vmem>>, vector<1x8x8xf32>
    %67 = vector.shape_cast %66 : vector<1x8x8xf32> to vector<8x8xf32>
    %68 = vector.shape_cast %65 : vector<8x8xf32> to vector<1x8x8xf32>
    tpu.vector_store %arg6[%c0_35, %c0_36, %c40], %68 {strides = array<i32>} : memref<1x8x96xf32, #tpu.memory_space<vmem>>, vector<1x8x8xf32>,
    %69 = vector.extract_strided_slice %17 {offsets = [6, 0, 0], sizes = [1, 8, 8], strides = [1, 1, 1]} : vector<12x8x8xf32> to vector<1x8x8xf32>
    %70 = vector.shape_cast %69 : vector<1x8x8xf32> to vector<8x8xf32>
    %71 = vector.extract_strided_slice %5 {offsets = [6, 0, 0], sizes = [1, 8, 8], strides = [1, 1, 1]} : vector<12x8x8xf32> to vector<1x8x8xf32>
    %72 = vector.shape_cast %71 : vector<1x8x8xf32> to vector<8x8xf32>
    %cst_37 = arith.constant dense<0.000000e+00> : vector<8x8xf32>
    %73 = tpu.matmul %70, %72, %cst_37 {dimension_numbers = #tpu.dot_dimension_numbers<[1], [0], [0], [1], [0, 0, 1, 1], [], []>} : vector<8x8xf32>, vector<8x8xf32>, vector<8x8xf32> -> vector<8x8xf32>
    %c0_38 = arith.constant 0 : index
    %c0_39 = arith.constant 0 : index
    %c48 = arith.constant 48 : index
    %74 = vector.load %arg6[%c0_38, %c0_39, %c48] : memref<1x8x96xf32, #tpu.memory_space<vmem>>, vector<1x8x8xf32>
    %75 = vector.shape_cast %74 : vector<1x8x8xf32> to vector<8x8xf32>
    %76 = vector.shape_cast %73 : vector<8x8xf32> to vector<1x8x8xf32>
    tpu.vector_store %arg6[%c0_38, %c0_39, %c48], %76 {strides = array<i32>} : memref<1x8x96xf32, #tpu.memory_space<vmem>>, vector<1x8x8xf32>,
    %77 = vector.extract_strided_slice %17 {offsets = [7, 0, 0], sizes = [1, 8, 8], strides = [1, 1, 1]} : vector<12x8x8xf32> to vector<1x8x8xf32>
    %78 = vector.shape_cast %77 : vector<1x8x8xf32> to vector<8x8xf32>
    %79 = vector.extract_strided_slice %5 {offsets = [7, 0, 0], sizes = [1, 8, 8], strides = [1, 1, 1]} : vector<12x8x8xf32> to vector<1x8x8xf32>
    %80 = vector.shape_cast %79 : vector<1x8x8xf32> to vector<8x8xf32>
    %cst_40 = arith.constant dense<0.000000e+00> : vector<8x8xf32>
    %81 = tpu.matmul %78, %80, %cst_40 {dimension_numbers = #tpu.dot_dimension_numbers<[1], [0], [0], [1], [0, 0, 1, 1], [], []>} : vector<8x8xf32>, vector<8x8xf32>, vector<8x8xf32> -> vector<8x8xf32>
    %c0_41 = arith.constant 0 : index
    %c0_42 = arith.constant 0 : index
    %c56 = arith.constant 56 : index
    %82 = vector.load %arg6[%c0_41, %c0_42, %c56] : memref<1x8x96xf32, #tpu.memory_space<vmem>>, vector<1x8x8xf32>
    %83 = vector.shape_cast %82 : vector<1x8x8xf32> to vector<8x8xf32>
    %84 = vector.shape_cast %81 : vector<8x8xf32> to vector<1x8x8xf32>
    tpu.vector_store %arg6[%c0_41, %c0_42, %c56], %84 {strides = array<i32>} : memref<1x8x96xf32, #tpu.memory_space<vmem>>, vector<1x8x8xf32>,
    %85 = vector.extract_strided_slice %17 {offsets = [8, 0, 0], sizes = [1, 8, 8], strides = [1, 1, 1]} : vector<12x8x8xf32> to vector<1x8x8xf32>
    %86 = vector.shape_cast %85 : vector<1x8x8xf32> to vector<8x8xf32>
    %87 = vector.extract_strided_slice %5 {offsets = [8, 0, 0], sizes = [1, 8, 8], strides = [1, 1, 1]} : vector<12x8x8xf32> to vector<1x8x8xf32>
    %88 = vector.shape_cast %87 : vector<1x8x8xf32> to vector<8x8xf32>
    %cst_43 = arith.constant dense<0.000000e+00> : vector<8x8xf32>
    %89 = tpu.matmul %86, %88, %cst_43 {dimension_numbers = #tpu.dot_dimension_numbers<[1], [0], [0], [1], [0, 0, 1, 1], [], []>} : vector<8x8xf32>, vector<8x8xf32>, vector<8x8xf32> -> vector<8x8xf32>
    %c0_44 = arith.constant 0 : index
    %c0_45 = arith.constant 0 : index
    %c64 = arith.constant 64 : index
    %90 = vector.load %arg6[%c0_44, %c0_45, %c64] : memref<1x8x96xf32, #tpu.memory_space<vmem>>, vector<1x8x8xf32>
    %91 = vector.shape_cast %90 : vector<1x8x8xf32> to vector<8x8xf32>
    %92 = vector.shape_cast %89 : vector<8x8xf32> to vector<1x8x8xf32>
    tpu.vector_store %arg6[%c0_44, %c0_45, %c64], %92 {strides = array<i32>} : memref<1x8x96xf32, #tpu.memory_space<vmem>>, vector<1x8x8xf32>,
    %93 = vector.extract_strided_slice %17 {offsets = [9, 0, 0], sizes = [1, 8, 8], strides = [1, 1, 1]} : vector<12x8x8xf32> to vector<1x8x8xf32>
    %94 = vector.shape_cast %93 : vector<1x8x8xf32> to vector<8x8xf32>
    %95 = vector.extract_strided_slice %5 {offsets = [9, 0, 0], sizes = [1, 8, 8], strides = [1, 1, 1]} : vector<12x8x8xf32> to vector<1x8x8xf32>
    %96 = vector.shape_cast %95 : vector<1x8x8xf32> to vector<8x8xf32>
    %cst_46 = arith.constant dense<0.000000e+00> : vector<8x8xf32>
    %97 = tpu.matmul %94, %96, %cst_46 {dimension_numbers = #tpu.dot_dimension_numbers<[1], [0], [0], [1], [0, 0, 1, 1], [], []>} : vector<8x8xf32>, vector<8x8xf32>, vector<8x8xf32> -> vector<8x8xf32>
    %c0_47 = arith.constant 0 : index
    %c0_48 = arith.constant 0 : index
    %c72 = arith.constant 72 : index
    %98 = vector.load %arg6[%c0_47, %c0_48, %c72] : memref<1x8x96xf32, #tpu.memory_space<vmem>>, vector<1x8x8xf32>
    %99 = vector.shape_cast %98 : vector<1x8x8xf32> to vector<8x8xf32>
    %100 = vector.shape_cast %97 : vector<8x8xf32> to vector<1x8x8xf32>
    tpu.vector_store %arg6[%c0_47, %c0_48, %c72], %100 {strides = array<i32>} : memref<1x8x96xf32, #tpu.memory_space<vmem>>, vector<1x8x8xf32>,
    %101 = vector.extract_strided_slice %17 {offsets = [10, 0, 0], sizes = [1, 8, 8], strides = [1, 1, 1]} : vector<12x8x8xf32> to vector<1x8x8xf32>
    %102 = vector.shape_cast %101 : vector<1x8x8xf32> to vector<8x8xf32>
    %103 = vector.extract_strided_slice %5 {offsets = [10, 0, 0], sizes = [1, 8, 8], strides = [1, 1, 1]} : vector<12x8x8xf32> to vector<1x8x8xf32>
    %104 = vector.shape_cast %103 : vector<1x8x8xf32> to vector<8x8xf32>
    %cst_49 = arith.constant dense<0.000000e+00> : vector<8x8xf32>
    %105 = tpu.matmul %102, %104, %cst_49 {dimension_numbers = #tpu.dot_dimension_numbers<[1], [0], [0], [1], [0, 0, 1, 1], [], []>} : vector<8x8xf32>, vector<8x8xf32>, vector<8x8xf32> -> vector<8x8xf32>
    %c0_50 = arith.constant 0 : index
    %c0_51 = arith.constant 0 : index
    %c80 = arith.constant 80 : index
    %106 = vector.load %arg6[%c0_50, %c0_51, %c80] : memref<1x8x96xf32, #tpu.memory_space<vmem>>, vector<1x8x8xf32>
    %107 = vector.shape_cast %106 : vector<1x8x8xf32> to vector<8x8xf32>
    %108 = vector.shape_cast %105 : vector<8x8xf32> to vector<1x8x8xf32>
    tpu.vector_store %arg6[%c0_50, %c0_51, %c80], %108 {strides = array<i32>} : memref<1x8x96xf32, #tpu.memory_space<vmem>>, vector<1x8x8xf32>,
    %109 = vector.extract_strided_slice %17 {offsets = [11, 0, 0], sizes = [1, 8, 8], strides = [1, 1, 1]} : vector<12x8x8xf32> to vector<1x8x8xf32>
    %110 = vector.shape_cast %109 : vector<1x8x8xf32> to vector<8x8xf32>
    %111 = vector.extract_strided_slice %5 {offsets = [11, 0, 0], sizes = [1, 8, 8], strides = [1, 1, 1]} : vector<12x8x8xf32> to vector<1x8x8xf32>
    %112 = vector.shape_cast %111 : vector<1x8x8xf32> to vector<8x8xf32>
    %cst_52 = arith.constant dense<0.000000e+00> : vector<8x8xf32>
    %113 = tpu.matmul %110, %112, %cst_52 {dimension_numbers = #tpu.dot_dimension_numbers<[1], [0], [0], [1], [0, 0, 1, 1], [], []>} : vector<8x8xf32>, vector<8x8xf32>, vector<8x8xf32> -> vector<8x8xf32>
    %c0_53 = arith.constant 0 : index
    %c0_54 = arith.constant 0 : index
    %c88 = arith.constant 88 : index
    %114 = vector.load %arg6[%c0_53, %c0_54, %c88] : memref<1x8x96xf32, #tpu.memory_space<vmem>>, vector<1x8x8xf32>
    %115 = vector.shape_cast %114 : vector<1x8x8xf32> to vector<8x8xf32>
    %116 = vector.shape_cast %113 : vector<8x8xf32> to vector<1x8x8xf32>
    tpu.vector_store %arg6[%c0_53, %c0_54, %c88], %116 {strides = array<i32>} : memref<1x8x96xf32, #tpu.memory_space<vmem>>, vector<1x8x8xf32>,
    return
  }
  func.func @transform_0(%arg0: i32, %arg1: i32, %arg2: i32) -> (i32, i32, i32, i32) {
    %c0_i32 = arith.constant 0 : i32
    %c0_i32_0 = arith.constant 0 : i32
    return %arg0, %arg1, %arg2, %c0_i32 : i32, i32, i32, i32
  }
  func.func @transform_1(%arg0: i32, %arg1: i32, %arg2: i32) -> (i32, i32, i32, i32) {
    %c0_i32 = arith.constant 0 : i32
    %c0_i32_0 = arith.constant 0 : i32
    %c0_i32_1 = arith.constant 0 : i32
    return %arg0, %arg1, %c0_i32, %c0_i32_0 : i32, i32, i32, i32
  }
  func.func @transform_2(%arg0: i32, %arg1: i32, %arg2: i32) -> (i32, i32, i32, i32) {
    %c0_i32 = arith.constant 0 : i32
    %c0_i32_0 = arith.constant 0 : i32
    %c0_i32_1 = arith.constant 0 : i32
    return %arg0, %arg1, %c0_i32, %c0_i32_0 : i32, i32, i32, i32
  }
  func.func @transform_3(%arg0: i32, %arg1: i32, %arg2: i32) -> (i32, i32, i32) {
    %c0_i32 = arith.constant 0 : i32
    return %arg0, %arg2, %arg1 : i32, i32, i32
  }
  func.func @transform_4(%arg0: i32, %arg1: i32, %arg2: i32) -> (i32, i32, i32, i32) {
    %c0_i32 = arith.constant 0 : i32
    %c0_i32_0 = arith.constant 0 : i32
    return %arg0, %arg1, %arg2, %c0_i32 : i32, i32, i32, i32
  }
}

</mosaic_0001>

<bundles_post_ra>
// kernel: tpu_custom_call.1
= control target key start
LH: loop header
LB: loop body
LE: loop exit
PB: predicated region body
PF: predicated region fallthrough
CT: control target
= control target key end

     0   :  { %10 = vsyncpa [#allocation3], 0  ;;  %s3400_s0 = inlined_call_operand.vmem [shape: f32[2,12,8,8], index: 0, kind: input, shape index: {}]   ;;  %s3401_s1 = inlined_call_operand.vmem [shape: f32[2,12,8,8], index: 1, kind: input, shape index: {}]   ;;  %s3402_s2 = inlined_call_operand.vmem [shape: f32[2,12,8,8], index: 2, kind: input, shape index: {}]   ;;  %s3403_s3 = inlined_call_operand.hbm [shape: f32[2,8,96], index: 3, kind: output, shape index: {0}]   ;;  %s3404_s4 = inlined_call_operand.vmem [shape: f32[2,12,8,8], index: 4, kind: output, shape index: {1}]  }
   0x1   :  { %12 = vsyncpa [#allocation3 + $0x1], 0  ;;  %s2997_s15 = smov 0   ;;  %s2999_s16 = smov 0  }
   0x2   :  { %s3001_s17 = smov 0   ;;  %s3003_s18 = smov 0  }
   0x3   :  { %s3005_s19 = smov 0   ;;  %s3007_s20 = smov 0  }
   0x4 LB: > { %s2555_s21 = sadd.s32 4294967295, %s2956_s20   ;;  %s2556_s22 = sadd.s32 4294967294, %s2956_s20   ;;  %s2956_s20 = sphi %s3007_s20, %s18_s20   ;;  %s2952_s19 = sphi %s3005_s19, %s3411_s19   ;;  %s2948_s18 = sphi %s3003_s18, %s3410_s18   ;;  %s2944_s17 = sphi %s3001_s17, %s3409_s17   ;;  %s2940_s16 = sphi %s2999_s16, %s3408_s16   ;;  %s2936_s15 = sphi %s2997_s15, %s3407_s15  }
   0x5   : > { %s37_s23 = sadd.s32 1, %s2952_s19  ;;  %s134_s24 = sadd.s32 1, %s2944_s17 }
   0x6   : > { %p39_p0 = scmp.ge.s32.totalorder %s37_s23, 2  ;;  %p144_p1 = scmp.ne.s32.totalorder %s2944_s17, %s2940_s16 }
   0x7   : > { %p145_p2 = scmp.eq.s32.totalorder %s2555_s21, 1  ;;  %p150_p3 = scmp.ne.s32.totalorder %s2940_s16, %s2936_s15 }
   0x8   : > { %s3413_s23 = smov (%p39_p0, %s37_s23), 0  ;;  %p151_p5 = scmp.eq.s32.totalorder %s2556_s22, 1 }
   0x9   : > { %p3037_p4 = por %p145_p2, %p144_p1  ;;  %s127_s26 = ssub.s32 %s2952_s19, %s3413_s23 }
   0xa   : > { %p2559_p6 = scmp.ge.s32.totalorder %s2956_s20, 1  ;;  %p132_p7 = scmp.eq.s32.totalorder %s127_s26, 0 }
   0xb   : > { %p3044_p8 = por %p151_p5, %p150_p3  ;;  %p241_p9 = scmp.lt.s32.totalorder %s2956_s20, 3 }
   0xc   : > { %s3050_s28 = scalar_select %p132_p7, %s2944_s17, %s134_s24  }
   0xd   : > { %p242_p10 = pnand %p2559_p6, %p241_p9 }
   0xe   : > { %p305_p11 = scmp.lt.s32.totalorder (!%p242_p10), %s2948_s18, 1  ;;  %v2958_v0 = vmov (!%p242_p10), 0.0   ;;  %vm2959_vm0 = vmmov (!%p242_p10), 0   ;;  %vm386_vm1 = vcmask (!%p242_p10), 64512   ;;  %s287_s24 = sand.u32 (!%p242_p10), 1, %s2940_s16   ;;  %vm1570_vm2 = vcmask (!%p242_p10), 130112  }
   0xf   : > { %245 = sbr.rel (%p242_p10) target bundleno = 924 (0x39c), region = 32  ;;  %2641 = vmatprep.subr.mxu0 (!%p242_p10), %v2958_v0  ;;  %2643 = vmatprep.mubr.msk.f32.mxu0 (!%p242_p10), %vm2959_vm0, %v2958_v0  ;;  %s2560_s26 = sshll.u32 (!%p242_p10), %s287_s24, 3  ;;  %vm1649_vm3 = vcmask (!%p242_p10), 195712   ;;  %vm1728_vm4 = vcmask (!%p242_p10), 261312   ;;  %vm1807_vm5 = vcmask (!%p242_p10), 326912   ;;  %vm1886_vm6 = vcmask (!%p242_p10), 392512  }
  0x10   : > { %2646 = vmatprep.subr.mxu1 (!%p242_p10), %v2958_v0  ;;  %2648 = vmatprep.mubr.msk.f32.mxu1 (!%p242_p10), %vm2959_vm0, %v2958_v0  ;;  %s2961_s5 = smov (!%p242_p10), 16   ;;  %s2962_s6 = smov (!%p242_p10), 24   ;;  %vm1965_vm7 = vcmask (!%p242_p10), 458112   ;;  %vm2044_vm8 = vcmask (!%p242_p10), 523712   ;;  %vm2123_vm9 = vcmask (!%p242_p10), 589312   ;;  %vm2202_vm10 = vcmask (!%p242_p10), 654912  }
  0x11   : > { %s2964_s8 = smov (!%p242_p10), 32   ;;  %s2965_s9 = smov (!%p242_p10), 56   ;;  %vm2281_vm11 = vcmask (!%p242_p10), 720512   ;;  %vm2360_vm12 = vcmask (!%p242_p10), 786112  }
  0x12   : > { %s2967_s11 = smov (!%p242_p10), 72   ;;  %s2968_s12 = smov (!%p242_p10), 64  }
  0x13   : > { %s2970_s14 = smov (!%p242_p10), 80   ;;  %s2590_s21 = sshll.u32 (!%p242_p10), %s2948_s18, 7 }
  0x16   : > { %s306_s29 = scalar_select %p305_p11, %s2948_s18, 1 }
  0x17   : > { %s2363_s18 = scalar_lea.sflag [#allocation3], %s287_s24 }
  0x18   : > { %s3060_s30 = smul.u32 96, %s306_s29  ;;  %s3331_s29 = scalar_lea.vmem [#allocation2], %s2560_s26 }
  0x1a   : > { %s3066_s7 = scalar_lea.vmem %s3401_s1, %s3060_s30  ;;  %s3072_s10 = scalar_lea.vmem %s3400_s0, %s3060_s30 }
  0x1b   : > { %v362_v1 = vld [vmem:[%s3066_s7] sm:$0xff]  ;;  %v364_v3 = vld [vmem:[%s3066_s7 + $0x10] sm:$0xff]  ;;  %v363_v4 = vld [vmem:[%s3066_s7 + $0x8] sm:$0xff]  ;;  %s3230_s13 = scalar_lea.vmem %s3402_s2, %s3060_s30  ;;  %s3240_s22 = scalar_lea.vmem %s3404_s4, %s3060_s30 }
  0x1c   : > { %v350_v2 = vld [vmem:[%s3072_s10] sm:$0xff]  ;;  %2642 = vmatpush3.msra.mxu0 %v362_v1  ;;  %v351_v5 = vld [vmem:[%s3072_s10 + $0x8] sm:$0xff]  ;;  %2647 = vmatpush3.msra.mxu1 %v363_v4  ;;  %v352_v6 = vld [vmem:[%s3072_s10 + $0x10] sm:$0xff]  ;;  %s2960_s30 = smov 8  }
  0x1d   : > { %2644 = vmatmul.mubr.msk.f32.vlgmr.msra.gmra.mrb[0].mxu0 %vm386_vm1, %v350_v2  ;;  %2651 = vmatprep.subr.mxu0 %v2958_v0  ;;  %v365_v7 = vld [vmem:[%s3066_s7 + $0x18] sm:$0xff]  ;;  %v366_v8 = vld [vmem:[%s3066_s7 + $0x20] sm:$0xff]  ;;  %v367_v11 = vld [vmem:[%s3066_s7 + $0x28] sm:$0xff] }
  0x1e   : > { %2652 = vmatpush3.msra.mxu0 %v364_v3  ;;  %2653 = vmatprep.mubr.msk.f32.mxu0 %vm2959_vm0, %v2958_v0  ;;  %v353_v9 = vld [vmem:[%s3072_s10 + $0x18] sm:$0xff]  ;;  %v354_v10 = vld [vmem:[%s3072_s10 + $0x20] sm:$0xff]  ;;  %v368_v12 = vld [vmem:[%s3066_s7 + $0x30] sm:$0xff] }
  0x1f   : > { %2649 = vmatmul.mubr.msk.f32.vlgmr.msra.gmra.mrb[0].mxu1 %vm386_vm1, %v351_v5  ;;  %2656 = vmatprep.subr.mxu1 %v2958_v0  ;;  %v355_v13 = vld [vmem:[%s3072_s10 + $0x28] sm:$0xff]  ;;  %v356_v14 = vld [vmem:[%s3072_s10 + $0x30] sm:$0xff]  ;;  %v369_v15 = vld [vmem:[%s3066_s7 + $0x38] sm:$0xff] }
  0x20   : > { %2661 = vmatprep.subr.mxu0 %v2958_v0  ;;  %2657 = vmatpush3.msra.mxu1 %v365_v7  ;;  %v370_v16 = vld [vmem:[%s3066_s7 + $0x40] sm:$0xff]  ;;  %v357_v17 = vld [vmem:[%s3072_s10 + $0x38] sm:$0xff]  ;;  %v371_v19 = vld [vmem:[%s3066_s7 + $0x48] sm:$0xff] }
  0x21   : > { %2654 = vmatmul.mubr.msk.f32.vlgmr.msra.gmra.mrb[2].mxu0 %vm386_vm1, %v352_v6  ;;  %2658 = vmatprep.mubr.msk.f32.mxu1 %vm2959_vm0, %v2958_v0  ;;  %v358_v18 = vld [vmem:[%s3072_s10 + $0x40] sm:$0xff]  ;;  %v372_v20 = vld [vmem:[%s3066_s7 + $0x50] sm:$0xff]  ;;  %v359_v21 = vld [vmem:[%s3072_s10 + $0x48] sm:$0xff] }
  0x22   : > { %2662 = vmatpush3.msra.mxu0 %v366_v8  ;;  %2663 = vmatprep.mubr.msk.f32.mxu0 %vm2959_vm0, %v2958_v0  ;;  %v360_v22 = vld [vmem:[%s3072_s10 + $0x50] sm:$0xff]  ;;  %v373_v23 = vld [vmem:[%s3066_s7 + $0x58] sm:$0xff]  ;;  %s2963_s7 = smov 40  }
  0x23   : > { %2659 = vmatmul.mubr.msk.f32.vlgmr.msra.gmra.mrb[2].mxu1 %vm386_vm1, %v353_v9  ;;  %2666 = vmatprep.subr.mxu1 %v2958_v0  ;;  %v361_v24 = vld [vmem:[%s3072_s10 + $0x58] sm:$0xff]  ;;  %s2966_s10 = smov 48  }
  0x24   : > { %2671 = vmatprep.subr.mxu0 %v2958_v0  ;;  %2667 = vmatpush3.msra.mxu1 %v367_v11 }
  0x25   : > { %2664 = vmatmul.mubr.msk.f32.vlgmr.msra.gmra.mrb[4].mxu0 %vm386_vm1, %v354_v10  ;;  %2668 = vmatprep.mubr.msk.f32.mxu1 %vm2959_vm0, %v2958_v0 }
  0x26   : > { %2672 = vmatpush3.msra.mxu0 %v368_v12  ;;  %2673 = vmatprep.mubr.msk.f32.mxu0 %vm2959_vm0, %v2958_v0 }
  0x27   : > { %2669 = vmatmul.mubr.msk.f32.vlgmr.msra.gmra.mrb[4].mxu1 %vm386_vm1, %v355_v13  ;;  %2676 = vmatprep.subr.mxu1 %v2958_v0 }
  0x28   : > { %2681 = vmatprep.subr.mxu0 %v2958_v0  ;;  %2677 = vmatpush3.msra.mxu1 %v369_v15 }
  0x29   : > { %2674 = vmatmul.mubr.msk.f32.vlgmr.msra.gmra.mrb[6].mxu0 %vm386_vm1, %v356_v14  ;;  %2678 = vmatprep.mubr.msk.f32.mxu1 %vm2959_vm0, %v2958_v0 }
  0x2a   : > { %2682 = vmatpush3.msra.mxu0 %v370_v16  ;;  %2683 = vmatprep.mubr.msk.f32.mxu0 %vm2959_vm0, %v2958_v0 }
  0x2b   : > { %2679 = vmatmul.mubr.msk.f32.vlgmr.msra.gmra.mrb[6].mxu1 %vm386_vm1, %v357_v17  ;;  %2686 = vmatprep.subr.mxu1 %v2958_v0 }
  0x2c   : > { %2691 = vmatprep.subr.mxu0 %v2958_v0  ;;  %2687 = vmatpush3.msra.mxu1 %v371_v19 }
  0x2d   : > { %2684 = vmatmul.mubr.msk.f32.vlgmr.msra.gmra.mrb[8].mxu0 %vm386_vm1, %v358_v18  ;;  %2688 = vmatprep.mubr.msk.f32.mxu1 %vm2959_vm0, %v2958_v0 }
  0x2e   : > { %2692 = vmatpush3.msra.mxu0 %v372_v20  ;;  %2693 = vmatprep.mubr.msk.f32.mxu0 %vm2959_vm0, %v2958_v0 }
  0x2f   : > { %2689 = vmatmul.mubr.msk.f32.vlgmr.msra.gmra.mrb[8].mxu1 %vm386_vm1, %v359_v21  ;;  %2696 = vmatprep.subr.mxu1 %v2958_v0 }
  0x30   : > { %2698 = vmatprep.mubr.msk.f32.mxu1 %vm2959_vm0, %v2958_v0  ;;  %2697 = vmatpush3.msra.mxu1 %v373_v23 }
  0x31   : > { %2694 = vmatmul.mubr.msk.f32.vlgmr.msra.gmra.mrb[10].mxu0 %vm386_vm1, %v360_v22  ;;  %2701 = vmatprep.subr.mxu0 %v2958_v0 }
  0x32   : > { %2703 = vmatprep.mubr.msk.f32.mxu0 %vm2959_vm0, %v2958_v0  ;;  %2706 = vmatprep.subr.mxu1 %v2958_v0 }
  0x33   : > { %2699 = vmatmul.mubr.msk.f32.vlgmr.msra.gmra.mrb[10].mxu1 %vm386_vm1, %v361_v24 }
  0x34   : > { %2708 = vmatprep.mubr.msk.f32.mxu1 %vm2959_vm0, %v2958_v0 }
  0xf0   : > { %v456_v25 = vpop.f32.mrb[0].mxu0 }
  0xf1   : > { %v1263_v26 = vmul.f32 0.35355338, %v456_v25  ;;  %v2645_v27 = vpop.f32.mrb[1].mxu0 }
  0xf2   : > { %v529_v28 = vpop.f32.mrb[0].mxu1 }
  0xf3   : > { %v3146_v29 = vmul.f32 0.35355338, %v529_v28  ;;  %v1275_v30 = vsel %vm386_vm1, %v1263_v26, -inf  ;;  %v2650_v31 = vpop.f32.mrb[1].mxu1 }
  0xf4   : > { %1276 = vmax.xlane.f32.xlu0 %v1275_v30  ;;  %v602_v32 = vpop.f32.mrb[2].mxu0 }
  0xf5   : > { %v1265_v33 = vmul.f32 0.35355338, %v602_v32  ;;  %v2655_v34 = vpop.f32.mrb[3].mxu0  ;;  %v1278_v35 = vsel %vm386_vm1, %v3146_v29, -inf }
  0xf6   : > { %v675_v36 = vpop.f32.mrb[2].mxu1 }
  0xf7   : > { %v3151_v37 = vmul.f32 0.35355338, %v675_v36  ;;  %v1281_v38 = vsel %vm386_vm1, %v1265_v33, -inf  ;;  %v2660_v39 = vpop.f32.mrb[3].mxu1 }
  0xf8   : > { %1279 = vmax.xlane.f32.xlu0 %v1278_v35  ;;  %1282 = vmax.xlane.f32.xlu1 %v1281_v38  ;;  %v748_v40 = vpop.f32.mrb[4].mxu0 }
  0xf9   : > { %v1267_v41 = vmul.f32 0.35355338, %v748_v40  ;;  %v2665_v42 = vpop.f32.mrb[5].mxu0  ;;  %v1284_v43 = vsel %vm386_vm1, %v3151_v37, -inf }
  0xfa   : > { %v821_v44 = vpop.f32.mrb[4].mxu1 }
  0xfb   : > { %v1268_v45 = vmul.f32 0.35355338, %v821_v44  ;;  %v1287_v46 = vsel %vm386_vm1, %v1267_v41, -inf  ;;  %v2670_v47 = vpop.f32.mrb[5].mxu1 }
  0xfc   : > { %1285 = vmax.xlane.f32.xlu1 %v1284_v43  ;;  %1288 = vmax.xlane.f32.xlu0 %v1287_v46  ;;  %v894_v48 = vpop.f32.mrb[6].mxu0 }
  0xfd   : > { %v1269_v49 = vmul.f32 0.35355338, %v894_v48  ;;  %v2675_v50 = vpop.f32.mrb[7].mxu0  ;;  %v1290_v51 = vsel %vm386_vm1, %v1268_v45, -inf }
  0xfe   : > { %v967_v52 = vpop.f32.mrb[6].mxu1 }
  0xff   : > { %v3158_v53 = vmul.f32 0.35355338, %v967_v52  ;;  %v1293_v54 = vsel %vm386_vm1, %v1269_v49, -inf  ;;  %v2680_v55 = vpop.f32.mrb[7].mxu1 }
 0x100   : > { %1291 = vmax.xlane.f32.xlu1 %v1290_v51  ;;  %1294 = vmax.xlane.f32.xlu0 %v1293_v54  ;;  %v1040_v56 = vpop.f32.mrb[8].mxu0 }
 0x101   : > { %v1271_v57 = vmul.f32 0.35355338, %v1040_v56  ;;  %v2685_v58 = vpop.f32.mrb[9].mxu0  ;;  %v1296_v59 = vsel %vm386_vm1, %v3158_v53, -inf }
 0x102   : > { %v1113_v60 = vpop.f32.mrb[8].mxu1 }
 0x103   : > { %v3163_v61 = vmul.f32 0.35355338, %v1113_v60  ;;  %v1299_v62 = vsel %vm386_vm1, %v1271_v57, -inf  ;;  %v2690_v63 = vpop.f32.mrb[9].mxu1 }
 0x104   : > { %1297 = vmax.xlane.f32.xlu1 %v1296_v59  ;;  %1300 = vmax.xlane.f32.xlu0 %v1299_v62  ;;  %v1186_v1 = vpop.f32.mrb[10].mxu0 }
 0x105   : > { %v1273_v2 = vmul.f32 0.35355338, %v1186_v1  ;;  %v1302_v3 = vsel %vm386_vm1, %v3163_v61, -inf  ;;  %v2695_v4 = vpop.f32.mrb[11].mxu0 }
 0x106   : > { %v1259_v5 = vpop.f32.mrb[10].mxu1 }
 0x107   : > { %v3168_v6 = vmul.f32 0.35355338, %v1259_v5  ;;  %v1305_v7 = vsel %vm386_vm1, %v1273_v2, -inf  ;;  %v2700_v8 = vpop.f32.mrb[11].mxu1 }
 0x108   : > { %1303 = vmax.xlane.f32.xlu1 %v1302_v3  ;;  %1306 = vmax.xlane.f32.xlu0 %v1305_v7  ;;  %v374_v7 = vld [vmem:[%s3230_s13] sm:$0xff]  ;;  %v375_v8 = vld [vmem:[%s3230_s13 + $0x8] sm:$0xff] }
 0x109   : > { %v1308_v9 = vsel %vm386_vm1, %v3168_v6, -inf  ;;  %2702 = vmatpush3.msra.mxu0 %v374_v7  ;;  %2707 = vmatpush3.msra.mxu1 %v375_v8 }
 0x10a   : > { %2711 = vmatprep.subr.mxu0 %v2958_v0  ;;  %2716 = vmatprep.subr.mxu1 %v2958_v0 }
 0x10c   : > { %1309 = vmax.xlane.f32.xlu1 %v1308_v9 }
 0x181   : > { %v1277_v10 = vpop.xlane.xlu0 %1276 }
 0x182   : > { %v1311_v11 = vsub.f32 %v1263_v26, %v1277_v10 }
 0x184   : > { %v1323_v12 = vmul.f32 1.442695, %v1311_v11 }
 0x185   : > { %v1280_v13 = vpop.xlane.xlu0 %1279  ;;  %v1283_v14 = vpop.xlane.xlu1 %1282 }
 0x186   : > { %2830 = vpow2.f32 %v1323_v12  ;;  %v1312_v15 = vsub.f32 %v3146_v29, %v1280_v13  ;;  %v1313_v16 = vsub.f32 %v1265_v33, %v1283_v14 }
 0x188   : > { %v1325_v17 = vmul.f32 1.442695, %v1312_v15  ;;  %v1327_v18 = vmul.f32 1.442695, %v1313_v16 }
 0x189   : > { %v1286_v19 = vpop.xlane.xlu1 %1285  ;;  %v1289_v20 = vpop.xlane.xlu0 %1288 }
 0x18a   : > { %2832 = vpow2.f32 %v1325_v17  ;;  %v1314_v21 = vsub.f32 %v3151_v37, %v1286_v19  ;;  %v1315_v22 = vsub.f32 %v1267_v41, %v1289_v20  ;;  %v376_v17 = vld [vmem:[%s3230_s13 + $0x10] sm:$0xff] }
 0x18b   : > { %2834 = vpow2.f32 %v1327_v18 }
 0x18c   : > { %v1329_v23 = vmul.f32 1.442695, %v1314_v21  ;;  %v1331_v24 = vmul.f32 1.442695, %v1315_v22 }
 0x18d   : > { %v1292_v25 = vpop.xlane.xlu1 %1291  ;;  %v1295_v26 = vpop.xlane.xlu0 %1294 }
 0x18e   : > { %2836 = vpow2.f32 %v1329_v23  ;;  %v1316_v27 = vsub.f32 %v1268_v45, %v1292_v25  ;;  %v1317_v28 = vsub.f32 %v1269_v49, %v1295_v26  ;;  %v377_v23 = vld [vmem:[%s3230_s13 + $0x18] sm:$0xff]  ;;  %v378_v26 = vld [vmem:[%s3230_s13 + $0x20] sm:$0xff] }
 0x18f   : > { %2838 = vpow2.f32 %v1331_v24 }
 0x190   : > { %v3175_v30 = vpop.eup %2830  ;;  %v1333_v29 = vmul.f32 1.442695, %v1316_v27  ;;  %v1335_v31 = vmul.f32 1.442695, %v1317_v28 }
 0x191   : > { %v1298_v32 = vpop.xlane.xlu1 %1297  ;;  %v1301_v33 = vpop.xlane.xlu0 %1300  ;;  %v1347_v34 = vsel %vm386_vm1, %v3175_v30, 0.0 }
 0x192   : > { %2840 = vpow2.f32 %v1333_v29  ;;  %v1318_v35 = vsub.f32 %v3158_v53, %v1298_v32  ;;  %v1319_v36 = vsub.f32 %v1271_v57, %v1301_v33  ;;  %1348 = vadd.xlane.f32.xlu0 %v1347_v34  ;;  %v380_v34 = vld [vmem:[%s3230_s13 + $0x30] sm:$0xff] }
 0x193   : > { %2842 = vpow2.f32 %v1335_v31  ;;  %v379_v31 = vld [vmem:[%s3230_s13 + $0x28] sm:$0xff] }
 0x194   : > { %v3180_v37 = vpop.eup %2832  ;;  %v1337_v38 = vmul.f32 1.442695, %v1318_v35  ;;  %v1339_v39 = vmul.f32 1.442695, %v1319_v36 }
 0x195   : > { %v3182_v40 = vpop.eup %2834  ;;  %v1304_v41 = vpop.xlane.xlu1 %1303  ;;  %v1350_v43 = vsel %vm386_vm1, %v3180_v37, 0.0 }
 0x196   : > { %v1307_v42 = vpop.xlane.xlu0 %1306  ;;  %2844 = vpow2.f32 %v1337_v38  ;;  %v1320_v44 = vsub.f32 %v3163_v61, %v1304_v41  ;;  %1351 = vadd.xlane.f32.xlu1 %v1350_v43  ;;  %v1353_v46 = vsel %vm386_vm1, %v3182_v40, 0.0  ;;  %v382_v41 = vld [vmem:[%s3230_s13 + $0x40] sm:$0xff] }
 0x197   : > { %v1321_v45 = vsub.f32 %v1273_v2, %v1307_v42  ;;  %2846 = vpow2.f32 %v1339_v39  ;;  %1354 = vadd.xlane.f32.xlu0 %v1353_v46  ;;  %v381_v39 = vld [vmem:[%s3230_s13 + $0x38] sm:$0xff] }
 0x198   : > { %v3189_v47 = vpop.eup %2836  ;;  %v1341_v48 = vmul.f32 1.442695, %v1320_v44 }
 0x199   : > { %v1343_v49 = vmul.f32 1.442695, %v1321_v45  ;;  %v3191_v50 = vpop.eup %2838  ;;  %v1310_v51 = vpop.xlane.xlu1 %1309  ;;  %v1356_v52 = vsel %vm386_vm1, %v3189_v47, 0.0  ;;  %v383_v45 = vld [vmem:[%s3230_s13 + $0x48] sm:$0xff] }
 0x19a   : > { %2848 = vpow2.f32 %v1341_v48  ;;  %v1322_v53 = vsub.f32 %v3168_v6, %v1310_v51  ;;  %1357 = vadd.xlane.f32.xlu1 %v1356_v52  ;;  %v1359_v54 = vsel %vm386_vm1, %v3191_v50, 0.0  ;;  %v385_v51 = vld [vmem:[%s3230_s13 + $0x58] sm:$0xff] }
 0x19b   : > { %2850 = vpow2.f32 %v1343_v49  ;;  %1360 = vadd.xlane.f32.xlu0 %v1359_v54 }
 0x19c   : > { %v3198_v55 = vpop.eup %2840  ;;  %v1345_v56 = vmul.f32 1.442695, %v1322_v53 }
 0x19d   : > { %v3200_v57 = vpop.eup %2842  ;;  %v1362_v58 = vsel %vm386_vm1, %v3198_v55, 0.0 }
 0x19e   : > { %2852 = vpow2.f32 %v1345_v56  ;;  %1363 = vadd.xlane.f32.xlu1 %v1362_v58  ;;  %v1365_v59 = vsel %vm386_vm1, %v3200_v57, 0.0 }
 0x19f   : > { %1366 = vadd.xlane.f32.xlu0 %v1365_v59 }
 0x1a0   : > { %v3206_v60 = vpop.eup %2844 }
 0x1a1   : > { %v3208_v61 = vpop.eup %2846  ;;  %v1368_v62 = vsel %vm386_vm1, %v3206_v60, 0.0 }
 0x1a2   : > { %1369 = vadd.xlane.f32.xlu1 %v1368_v62  ;;  %v1371_v63 = vsel %vm386_vm1, %v3208_v61, 0.0 }
 0x1a3   : > { %1372 = vadd.xlane.f32.xlu0 %v1371_v63 }
 0x1a4   : > { %v3214_v1 = vpop.eup %2848 }
 0x1a5   : > { %v3216_v2 = vpop.eup %2850  ;;  %v1374_v3 = vsel %vm386_vm1, %v3214_v1, 0.0 }
 0x1a6   : > { %1375 = vadd.xlane.f32.xlu1 %v1374_v3  ;;  %v1377_v4 = vsel %vm386_vm1, %v3216_v2, 0.0 }
 0x1a7   : > { %1378 = vadd.xlane.f32.xlu0 %v1377_v4 }
 0x1a8   : > { %v3222_v5 = vpop.eup %2852 }
 0x1a9   : > { %v1380_v6 = vsel %vm386_vm1, %v3222_v5, 0.0 }
 0x1aa   : > { %1381 = vadd.xlane.f32.xlu1 %v1380_v6 }
 0x21f   : > { %v1349_v9 = vpop.xlane.xlu0 %1348 }
 0x220   : > { %2854 = vrcp.f32 %v1349_v9 }
 0x223   : > { %v1352_v10 = vpop.xlane.xlu1 %1351 }
 0x224   : > { %2856 = vrcp.f32 %v1352_v10  ;;  %v1355_v11 = vpop.xlane.xlu0 %1354 }
 0x225   : > { %2858 = vrcp.f32 %v1355_v11 }
 0x227   : > { %v1358_v12 = vpop.xlane.xlu1 %1357 }
 0x228   : > { %2860 = vrcp.f32 %v1358_v12  ;;  %v1361_v13 = vpop.xlane.xlu0 %1360 }
 0x229   : > { %2862 = vrcp.f32 %v1361_v13 }
 0x22a   : > { %v2855_v14 = vpop.eup %2854 }
 0x22b   : > { %v1384_v15 = vmul.f32 %v2855_v14, %v3175_v30  ;;  %v1364_v16 = vpop.xlane.xlu1 %1363 }
 0x22c   : > { %2864 = vrcp.f32 %v1364_v16  ;;  %v1367_v18 = vpop.xlane.xlu0 %1366 }
 0x22d   : > { %1407 = vst.msk [vmem:[%s3240_s22] sm:$0xff] %vm386_vm1, %v1384_v15  ;;  %2866 = vrcp.f32 %v1367_v18  ;;  %2704 = vmatmul.mubr.msk.f32.vlgmr.msra.gmra.mrb[12].mxu0 %vm386_vm1, %v1384_v15 }
 0x22e   : > { %v2857_v19 = vpop.eup %2856  ;;  %2712 = vmatpush3.msra.mxu0 %v376_v17  ;;  %2713 = vmatprep.mubr.msk.f32.mxu0 %vm2959_vm0, %v2958_v0 }
 0x22f   : > { %v2859_v20 = vpop.eup %2858  ;;  %v1386_v21 = vmul.f32 %v2857_v19, %v3180_v37  ;;  %v1370_v22 = vpop.xlane.xlu1 %1369  ;;  %2721 = vmatprep.subr.mxu0 %v2958_v0 }
 0x230   : > { %v1388_v24 = vmul.f32 %v2859_v20, %v3182_v40  ;;  %2868 = vrcp.f32 %v1370_v22  ;;  %v1373_v25 = vpop.xlane.xlu0 %1372 }
 0x231   : > { %1408 = vst.msk [vmem:[%s3240_s22 + $0x8] sm:$0xff] %vm386_vm1, %v1386_v21  ;;  %2870 = vrcp.f32 %v1373_v25  ;;  %2709 = vmatmul.mubr.msk.f32.vlgmr.msra.gmra.mrb[12].mxu1 %vm386_vm1, %v1386_v21 }
 0x232   : > { %v2861_v27 = vpop.eup %2860  ;;  %1409 = vst.msk [vmem:[%s3240_s22 + $0x10] sm:$0xff] %vm386_vm1, %v1388_v24  ;;  %2714 = vmatmul.mubr.msk.f32.vlgmr.msra.gmra.mrb[14].mxu0 %vm386_vm1, %v1388_v24  ;;  %2717 = vmatpush3.msra.mxu1 %v377_v23 }
 0x233   : > { %v2863_v28 = vpop.eup %2862  ;;  %v1390_v30 = vmul.f32 %v2861_v27, %v3189_v47  ;;  %v1376_v29 = vpop.xlane.xlu1 %1375  ;;  %2718 = vmatprep.mubr.msk.f32.mxu1 %vm2959_vm0, %v2958_v0  ;;  %2722 = vmatpush3.msra.mxu0 %v378_v26  ;;  %v384_v47 = vld [vmem:[%s3230_s13 + $0x50] sm:$0xff]  ;;  %s2969_s13 = smov 88  }
 0x234   : > { %v1392_v32 = vmul.f32 %v2863_v28, %v3191_v50  ;;  %2872 = vrcp.f32 %v1376_v29  ;;  %v1379_v33 = vpop.xlane.xlu0 %1378  ;;  %2723 = vmatprep.mubr.msk.f32.mxu0 %vm2959_vm0, %v2958_v0  ;;  %2726 = vmatprep.subr.mxu1 %v2958_v0 }
 0x235   : > { %1410 = vst.msk [vmem:[%s3240_s22 + $0x18] sm:$0xff] %vm386_vm1, %v1390_v30  ;;  %2874 = vrcp.f32 %v1379_v33  ;;  %2719 = vmatmul.mubr.msk.f32.vlgmr.msra.gmra.mrb[14].mxu1 %vm386_vm1, %v1390_v30  ;;  %2731 = vmatprep.subr.mxu0 %v2958_v0 }
 0x236   : > { %v2865_v35 = vpop.eup %2864  ;;  %1411 = vst.msk [vmem:[%s3240_s22 + $0x20] sm:$0xff] %vm386_vm1, %v1392_v32  ;;  %2724 = vmatmul.mubr.msk.f32.vlgmr.msra.gmra.mrb[16].mxu0 %vm386_vm1, %v1392_v32  ;;  %2727 = vmatpush3.msra.mxu1 %v379_v31 }
 0x237   : > { %v2867_v36 = vpop.eup %2866  ;;  %v1394_v37 = vmul.f32 %v2865_v35, %v3198_v55  ;;  %v1382_v38 = vpop.xlane.xlu1 %1381  ;;  %2728 = vmatprep.mubr.msk.f32.mxu1 %vm2959_vm0, %v2958_v0  ;;  %2732 = vmatpush3.msra.mxu0 %v380_v34 }
 0x238   : > { %v1396_v40 = vmul.f32 %v2867_v36, %v3200_v57  ;;  %2876 = vrcp.f32 %v1382_v38  ;;  %2733 = vmatprep.mubr.msk.f32.mxu0 %vm2959_vm0, %v2958_v0  ;;  %2736 = vmatprep.subr.mxu1 %v2958_v0 }
 0x239   : > { %1412 = vst.msk [vmem:[%s3240_s22 + $0x28] sm:$0xff] %vm386_vm1, %v1394_v37  ;;  %2729 = vmatmul.mubr.msk.f32.vlgmr.msra.gmra.mrb[16].mxu1 %vm386_vm1, %v1394_v37  ;;  %2741 = vmatprep.subr.mxu0 %v2958_v0 }
 0x23a   : > { %v2869_v42 = vpop.eup %2868  ;;  %1413 = vst.msk [vmem:[%s3240_s22 + $0x30] sm:$0xff] %vm386_vm1, %v1396_v40  ;;  %2734 = vmatmul.mubr.msk.f32.vlgmr.msra.gmra.mrb[18].mxu0 %vm386_vm1, %v1396_v40  ;;  %2737 = vmatpush3.msra.mxu1 %v381_v39 }
 0x23b   : > { %v2871_v43 = vpop.eup %2870  ;;  %v1398_v44 = vmul.f32 %v2869_v42, %v3206_v60  ;;  %2738 = vmatprep.mubr.msk.f32.mxu1 %vm2959_vm0, %v2958_v0  ;;  %2742 = vmatpush3.msra.mxu0 %v382_v41 }
 0x23c   : > { %v1400_v46 = vmul.f32 %v2871_v43, %v3208_v61  ;;  %2743 = vmatprep.mubr.msk.f32.mxu0 %vm2959_vm0, %v2958_v0  ;;  %2746 = vmatprep.subr.mxu1 %v2958_v0 }
 0x23d   : > { %1414 = vst.msk [vmem:[%s3240_s22 + $0x38] sm:$0xff] %vm386_vm1, %v1398_v44  ;;  %2739 = vmatmul.mubr.msk.f32.vlgmr.msra.gmra.mrb[18].mxu1 %vm386_vm1, %v1398_v44  ;;  %2751 = vmatprep.subr.mxu0 %v2958_v0 }
 0x23e   : > { %v2873_v48 = vpop.eup %2872  ;;  %1415 = vst.msk [vmem:[%s3240_s22 + $0x40] sm:$0xff] %vm386_vm1, %v1400_v46  ;;  %2744 = vmatmul.mubr.msk.f32.vlgmr.msra.gmra.mrb[20].mxu0 %vm386_vm1, %v1400_v46  ;;  %2747 = vmatpush3.msra.mxu1 %v383_v45 }
 0x23f   : > { %v2875_v49 = vpop.eup %2874  ;;  %v1402_v50 = vmul.f32 %v2873_v48, %v3214_v1  ;;  %2748 = vmatprep.mubr.msk.f32.mxu1 %vm2959_vm0, %v2958_v0  ;;  %2752 = vmatpush3.msra.mxu0 %v384_v47 }
 0x240   : > { %v1404_v52 = vmul.f32 %v2875_v49, %v3216_v2  ;;  %2753 = vmatprep.mubr.msk.f32.mxu0 %vm2959_vm0, %v2958_v0  ;;  %2756 = vmatprep.subr.mxu1 %v2958_v0 }
 0x241   : > { %1416 = vst.msk [vmem:[%s3240_s22 + $0x48] sm:$0xff] %vm386_vm1, %v1402_v50  ;;  %2749 = vmatmul.mubr.msk.f32.vlgmr.msra.gmra.mrb[20].mxu1 %vm386_vm1, %v1402_v50 }
 0x242   : > { %v2877_v53 = vpop.eup %2876  ;;  %1417 = vst.msk [vmem:[%s3240_s22 + $0x50] sm:$0xff] %vm386_vm1, %v1404_v52  ;;  %2754 = vmatmul.mubr.msk.f32.vlgmr.msra.gmra.mrb[22].mxu0 %vm386_vm1, %v1404_v52  ;;  %2757 = vmatpush3.msra.mxu1 %v385_v51 }
 0x243   : > { %v1406_v54 = vmul.f32 %v2877_v53, %v3222_v5  ;;  %2758 = vmatprep.mubr.msk.f32.mxu1 %vm2959_vm0, %v2958_v0 }
 0x245   : > { %1418 = vst.msk [vmem:[%s3240_s22 + $0x58] sm:$0xff] %vm386_vm1, %v1406_v54  ;;  %2759 = vmatmul.mubr.msk.f32.vlgmr.msra.gmra.mrb[22].mxu1 %vm386_vm1, %v1406_v54  ;;  %s2390_s22 = sshll.u32 %s3331_s29, 4  ;;  %s3351_s22 = int_to_ptr.vmem [resolvable:$true] %s2390_s22 }
 0x300   : > { %v1488_v55 = vpop.f32.mrb[12].mxu0 }
 0x301   : > { %1492 = vst.msk [vmem:[%s3331_s29] sm:$0xff] %vm386_vm1, %v1488_v55  ;;  %v2705_v56 = vpop.f32.mrb[13].mxu0 }
 0x304   : > { %v1562_v57 = vpop.f32.mrb[12].mxu1 }
 0x305   : > { %v1641_v58 = vpop.f32.mrb[14].mxu0  ;;  %v2710_v59 = vpop.f32.mrb[13].mxu1  ;;  %1567 = vrot.lane.b32.xlu0 %v1562_v57, %s2960_s30 }
 0x306   : > { %1646 = vrot.lane.b32.xlu1 %v1641_v58, %s2961_s5  ;;  %v2715_v0 = vpop.f32.mrb[15].mxu0  ;;  %s3349_s5 = scalar_lea.hbm %s3403_s3, %s2590_s21 }
 0x308   : > { %v1720_v60 = vpop.f32.mrb[14].mxu1 }
 0x309   : > { %v1799_v61 = vpop.f32.mrb[16].mxu0  ;;  %v2720_v62 = vpop.f32.mrb[15].mxu1 }
 0x30a   : > { %1725 = vrot.lane.b32.xlu1 %v1720_v60, %s2962_s6  ;;  %v2725_v63 = vpop.f32.mrb[17].mxu0  ;;  %s2878_s6 = scalar_lea.vmem %s3351_s22, 128 }
 0x30b   : > { %p2879_p12 = scmp.ne.s32.totalorder %s3351_s22, %s2878_s6 }
 0x30c   : > { %v1878_v1 = vpop.f32.mrb[16].mxu1 }
 0x30d   : > { %v1957_v2 = vpop.f32.mrb[18].mxu0  ;;  %v2730_v3 = vpop.f32.mrb[17].mxu1  ;;  %1883 = vrot.lane.b32.xlu0 %v1878_v1, %s2963_s7  ;;  %p2880_p13 = pnand %p2879_p12, %p3037_p4  ;;  %s2971_s7 = smov [#allocation2]  }
 0x30e   : > { %1804 = vrot.lane.b32.xlu1 %v1799_v61, %s2964_s8  ;;  %v2735_v4 = vpop.f32.mrb[19].mxu0  ;;  %s2882_s8 = sshll.u32 %s2971_s7, 4  ;;  %s2883_s8 = int_to_ptr.vmem [resolvable:$false] %s2882_s8 }
 0x30f   : > { %p2881_p0 = pneg %p2880_p13  ;;  %p2885_p1 = scmp.lt.s32.totalorder %s3351_s22, %s2883_s8 }
 0x310   : > { %v2036_v5 = vpop.f32.mrb[18].mxu1 }
 0x311   : > { %v2115_v6 = vpop.f32.mrb[20].mxu0  ;;  %v2740_v7 = vpop.f32.mrb[19].mxu1  ;;  %2041 = vrot.lane.b32.xlu0 %v2036_v5, %s2965_s9  ;;  %s2884_s9 = scalar_lea.vmem %s2883_s8, 256 }
 0x312   : > { %1962 = vrot.lane.b32.xlu1 %v1957_v2, %s2966_s10  ;;  %v2745_v8 = vpop.f32.mrb[21].mxu0  ;;  %p2886_p2 = scmp.lt.s32.totalorder %s2884_s9, %s2878_s6 }
 0x314   : > { %v2194_v9 = vpop.f32.mrb[20].mxu1  ;;  %p2887_p3 = por %p2886_p2, %p2885_p1 }
 0x315   : > { %v2273_v10 = vpop.f32.mrb[22].mxu0  ;;  %v2750_v11 = vpop.f32.mrb[21].mxu1  ;;  %2199 = vrot.lane.b32.xlu0 %v2194_v9, %s2967_s11 }
 0x316   : > { %2120 = vrot.lane.b32.xlu1 %v2115_v6, %s2968_s12  ;;  %v2755_v12 = vpop.f32.mrb[23].mxu0  ;;  %p2888_p5 = pnand %p2887_p3, %p2881_p0 }
 0x318   : > { %v2352_v13 = vpop.f32.mrb[22].mxu1 }
 0x319   : > { %v2760_v14 = vpop.f32.mrb[23].mxu1  ;;  %2357 = vrot.lane.b32.xlu0 %v2352_v13, %s2969_s13 }
 0x31a   : > { %2278 = vrot.lane.b32.xlu1 %v2273_v10, %s2970_s14 }
 0x377   : > { %v1568_v15 = vpop.permute.xlu0 %1567 }
 0x378   : > { %1571 = vst.msk [vmem:[%s3331_s29] sm:$0xff] %vm1570_vm2, %v1568_v15  ;;  %v1647_v16 = vpop.permute.xlu1 %1646 }
 0x379   : > { %1650 = vst.msk [vmem:[%s3331_s29] sm:$0xff] %vm1649_vm3, %v1647_v16 }
 0x37c   : > { %v1726_v17 = vpop.permute.xlu1 %1725 }
 0x37d   : > { %1729 = vst.msk [vmem:[%s3331_s29] sm:$0xff] %vm1728_vm4, %v1726_v17 }
 0x37f   : > { %v1884_v18 = vpop.permute.xlu0 %1883 }
 0x380   : > { %v1805_v19 = vpop.permute.xlu1 %1804 }
 0x381   : > { %1808 = vst.msk [vmem:[%s3331_s29] sm:$0xff] %vm1807_vm5, %v1805_v19 }
 0x382   : > { %1887 = vst.msk [vmem:[%s3331_s29] sm:$0xff] %vm1886_vm6, %v1884_v18 }
 0x383   : > { %v2042_v20 = vpop.permute.xlu0 %2041 }
 0x384   : > { %v1963_v21 = vpop.permute.xlu1 %1962 }
 0x385   : > { %1966 = vst.msk [vmem:[%s3331_s29] sm:$0xff] %vm1965_vm7, %v1963_v21 }
 0x386   : > { %2045 = vst.msk [vmem:[%s3331_s29] sm:$0xff] %vm2044_vm8, %v2042_v20 }
 0x387   : > { %v2200_v22 = vpop.permute.xlu0 %2199 }
 0x388   : > { %v2121_v23 = vpop.permute.xlu1 %2120 }
 0x389   : > { %2124 = vst.msk [vmem:[%s3331_s29] sm:$0xff] %vm2123_vm9, %v2121_v23 }
 0x38a   : > { %2203 = vst.msk [vmem:[%s3331_s29] sm:$0xff] %vm2202_vm10, %v2200_v22 }
 0x38b   : > { %v2358_v24 = vpop.permute.xlu0 %2357 }
 0x38c   : > { %v2279_v25 = vpop.permute.xlu1 %2278 }
 0x38d   : > { %2282 = vst.msk [vmem:[%s3331_s29] sm:$0xff] %vm2281_vm11, %v2279_v25 }
 0x38e   : > { %2361 = vst.msk [vmem:[%s3331_s29] sm:$0xff] %vm2360_vm12, %v2358_v24 }
 0x38f   : > { %2891 = shalt.err (!%p2888_p5)
}
 0x390   : > { %s2892_s24 = scalar_lea.hbm %s3349_s5, 128  ;;  %s2896_s11 = scalar_lea.hbm %s3403_s3, 256 }
 0x391   : > { %p2893_p6 = scmp.ne.s32.totalorder %s3349_s5, %s2892_s24  ;;  %p2897_p10 = scmp.lt.u32.totalorder %s3349_s5, %s3403_s3 }
 0x392   : > { %p2898_p11 = scmp.lt.u32.totalorder %s2896_s11, %s2892_s24  ;;  %p2900_p13 = scmp.lt.u32.totalorder %s2892_s24, %s3349_s5 }
 0x393   : > { %p2894_p7 = pnand %p2893_p6, %p3037_p4 }
 0x394   : > { %p2899_p12 = por %p2898_p11, %p2897_p10 }
 0x395   : > { %p2895_p9 = pneg %p2894_p7 }
 0x396   : > { %p2901_p0 = por %p2900_p13, %p2899_p12 }
 0x398   : > { %p2902_p1 = pnand %p2901_p0, %p2895_p9 }
 0x39a   : > { %2905 = shalt.err (!%p2902_p1)
}
 0x39b   : > { %2762 = dma.vmem_to_hbm [thread:$0]  (%p3037_p4), %s3351_s22, 128, %s3349_s5, %s2363_s18  }
 0x39c PF: > { %p2768_p2 = scmp.ge.s32.totalorder %s2956_s20, 2  ;;  %s2406_s14 = sand.u32 1, %s2936_s15  }
 0x39d   : > { %s2407_s21 = scalar_lea.sflag [#allocation3], %s2406_s14 }
 0x39e   : > { %p2765_p3 = pnand %p2768_p2, %p3044_p8 }
 0x3a0   : > { %2931 = dma.done.wait (!%p2765_p3), %s2407_s21, 128  }
 0x3a1   : > { %2933 = vsyncadd (!%p2765_p3), %s2407_s21, 4294967168  ;;  %s18_s20 = sadd.s32 1, %s2956_s20   ;;  %s3407_s15 = smov %s2940_s16 }
 0x3a2   : > { %p15_p5 = scmp.ge.s32.totalorder %s18_s20, 4   ;;  %s3408_s16 = smov %s2944_s17 }
 0x3a3   : > { %s3409_s17 = smov %s3050_s28  ;;  %s3410_s18 = smov %s2952_s19 }
 0x3a4   : > { %s3411_s19 = smov %s3413_s23  ;;  %17 = sbr.rel (!%p15_p5) target bundleno = 4 (0x4), region = 85 }
 0x3ab   :  { %2427 = vsyncpa [#allocation3], 1 }
 0x3ac   :  { %2429 = vsyncpa [#allocation3 + $0x1], 1 }

</bundles_post_ra>
